<compile_context>
chip_gen: v7x
topology: tpu7x:2x2x1
jax: 0.10.0
libtpu: 0.0.40
codegen_flags: <defaults>
</compile_context>

<pallas_src>
import numpy as np
import jax
import jax.numpy as jnp
from jax.experimental import pallas as pl
from jax.experimental.pallas import tpu as pltpu

_LANES = 128     # lane width of a vreg
_SUBLANES = 8    # sublane height of a (f32) vreg tile


# ----------------------------------------------------------------------------
# Deterministic "parameter" construction (the module's change_of_basis buffer).
# ----------------------------------------------------------------------------
def make_change_of_basis() -> np.ndarray:
    """Change of basis for ReducedTensorProducts('ij=ji', i='1o').

    Shape (6, 3, 3): row 0 is the 0e (trace) component, rows 1..5 are an
    orthonormal symmetric-traceless (2e) basis.  Each irrep block C satisfies
    sum(C**2) == ir.dim, matching e3nn's 'component' normalization.
    """
    # TODO(synk): exact e3nn sign/ordering conventions (wigner_3j based) for the
    # 2e block are not reproduced; this differs only by an init-time orthogonal
    # convention within the irrep block.
    q = np.zeros((6, 3, 3), dtype=np.float64)
    ex, ey, ez = np.eye(3, dtype=np.float64)

    def sym(a, b):
        return (np.outer(a, b) + np.outer(b, a)) / np.sqrt(2.0)

    q[0] = np.eye(3) / np.sqrt(3.0)                                    # 0e
    q[1] = sym(ex, ey)                                                 # 2e, m=-2
    q[2] = sym(ey, ez)                                                 # 2e, m=-1
    q[3] = (2.0 * np.outer(ez, ez) - np.outer(ex, ex)
            - np.outer(ey, ey)) / np.sqrt(6.0)                         # 2e, m=0
    q[4] = sym(ex, ez)                                                 # 2e, m=+1
    q[5] = (np.outer(ex, ex) - np.outer(ey, ey)) / np.sqrt(2.0)        # 2e, m=+2
    return q.astype(np.float32)


# ----------------------------------------------------------------------------
# Pallas kernel: out[z, n, l] = sum_{i,j} Q[z,i,j] * x[i, n, l] * y[j, n, l]
# (batch lives on the trailing (n, l) = (sublane, lane) axes; Q is baked in.)
# ----------------------------------------------------------------------------
def _make_rtp_kernel(cob: np.ndarray):
    dout, d1, d2 = cob.shape

    def kernel(x_ref, y_ref, o_ref):
        # x_ref: (d1, NB, 128)   y_ref: (d2, NB, 128)   o_ref: (dout, NB, 128)
        # Load each irrep component as a full (NB, 128) tile (full-width vregs).
        xs = [x_ref[i].astype(jnp.float32) for i in range(d1)]
        ys = [y_ref[j].astype(jnp.float32) for j in range(d2)]

        # Lazily build the unique products x_i * y_j actually needed.
        prods = {}

        def prod(i, j):
            if (i, j) not in prods:
                prods[(i, j)] = xs[i] * ys[j]
            return prods[(i, j)]

        # Unrolled VPU-only weighted sums; Q entries are Python constants
        # (splat-broadcast immediates), zeros are skipped entirely.
        for z in range(dout):
            acc = None
            for i in range(d1):
                for j in range(d2):
                    c = float(cob[z, i, j])
                    if abs(c) < 1e-12:
                        continue
                    term = c * prod(i, j)
                    acc = term if acc is None else acc + term
            if acc is None:
                acc = jnp.zeros_like(xs[0])
            # Full-tile, unmasked, lane-dense store of one output component.
            o_ref[z] = acc.astype(o_ref.dtype)

    return kernel


def reduced_tensor_products(x, y, change_of_basis, *, rows_per_tile: int = 64 * 1024):
    """Forward pass of ReducedTensorProducts('ij=ji', i='1o').

    x: (..., D1), y: (..., D2)  ->  (..., DOUT)

    `change_of_basis` must be a concrete (non-traced) array; it is baked into
    the kernel as constants.
    """
    cob = np.asarray(change_of_basis, dtype=np.float32)
    dout, d1, d2 = cob.shape
    assert x.shape[-1] == d1 and y.shape[-1] == d2
    assert x.shape[:-1] == y.shape[:-1]
    batch_shape = x.shape[:-1]

    xb = x.reshape(-1, d1)
    yb = y.reshape(-1, d2)
    b = xb.shape[0]

    # Batch tiling on the (sublane, lane) axes: pad batch to a whole number of
    # (nb_tile, 128) tiles, nb_tile a multiple of 8 sublanes.
    nb_req = -(-b // _LANES)                                  # sublane rows needed
    nb_tile = min(max(rows_per_tile // _LANES, _SUBLANES),
                  -(-nb_req // _SUBLANES) * _SUBLANES)
    nb_tile = max(_SUBLANES, (nb_tile // _SUBLANES) * _SUBLANES)
    nb_total = -(-nb_req // nb_tile) * nb_tile
    bp = nb_total * _LANES

    def to_lane_dense(a, d):
        a = a.astype(jnp.float32)
        if bp != b:
            a = jnp.pad(a, ((0, bp - b), (0, 0)))
        # (B, d) -> (d, B) -> (d, NB, 128): one-time XLA layout plumbing.
        return a.T.reshape(d, nb_total, _LANES)

    xt = to_lane_dense(xb, d1)
    yt = to_lane_dense(yb, d2)

    kernel = _make_rtp_kernel(cob)

    out = pl.pallas_call(
        kernel,
        out_shape=jax.ShapeDtypeStruct((dout, nb_total, _LANES), x.dtype),
        grid=(nb_total // nb_tile,),
        in_specs=[
            pl.BlockSpec((d1, nb_tile, _LANES), lambda t: (0, t, 0)),
            pl.BlockSpec((d2, nb_tile, _LANES), lambda t: (0, t, 0)),
        ],
        out_specs=pl.BlockSpec((dout, nb_tile, _LANES), lambda t: (0, t, 0)),
        compiler_params=pltpu.CompilerParams(
            dimension_semantics=("parallel",)),
    )(xt, yt)

    # (dout, NB, 128) -> (B, dout), strip padding, restore batch shape.
    out = out.reshape(dout, bp).T[:b]
    return out.reshape(batch_shape + (dout,))


if __name__ == "__main__":
    key = jax.random.PRNGKey(0)
    kx, ky = jax.random.split(key)

    q = make_change_of_basis()            # (6, 3, 3) == (irreps_out.dim, 3, 3)
    q_j = jnp.asarray(q)

    B = 8
    x = jax.random.normal(kx, (B, 3), dtype=jnp.float32)
    y = jax.random.normal(ky, (B, 3), dtype=jnp.float32)

    fwd = jax.jit(lambda a, b: reduced_tensor_products(a, b, q))

    out = fwd(x, y)
    jax.block_until_ready(out)

    # Reference: the module's documented semantics (einsum with change_of_basis).
    ref = jnp.einsum("zij,...i,...j->...z", q_j, x, y)
    assert out.shape == (B, 6), out.shape
    assert jnp.allclose(out, ref, atol=1e-5, rtol=1e-5), "mismatch vs einsum ref"

    # Symmetry of the formula 'ij=ji': tp(x, y) == tp(y, x).
    out_swapped = fwd(y, x)
    jax.block_until_ready(out_swapped)
    assert jnp.allclose(out, out_swapped, atol=1e-5, rtol=1e-5)

    # Unbatched (docstring-style) inputs also work.
    out1 = fwd(x[0], y[0])
    jax.block_until_ready(out1)
    assert out1.shape == (6,)
    assert jnp.allclose(out1, ref[0], atol=1e-5, rtol=1e-5)

    # Exercise the multi-step grid / padding path (still small) by shrinking
    # the batch tile: 3000 rows with 1024-row tiles -> 3 grid steps.
    kx2, ky2 = jax.random.split(ky)
    B2 = 3000
    x2 = jax.random.normal(kx2, (B2, 3), dtype=jnp.float32)
    y2 = jax.random.normal(ky2, (B2, 3), dtype=jnp.float32)
    fwd_tiled = jax.jit(
        lambda a, b: reduced_tensor_products(a, b, q, rows_per_tile=1024))
    out2 = fwd_tiled(x2, y2)
    jax.block_until_ready(out2)
    ref2 = jnp.einsum("zij,...i,...j->...z", q_j, x2, y2)
    assert out2.shape == (B2, 6)
    assert jnp.allclose(out2, ref2, atol=1e-4, rtol=1e-4)

    print("KERNEL_OK")
</pallas_src>

<mosaic_0001>
module attributes {stable_mosaic.version = 11 : i64} {
  func.func @kernel(%arg0: i32, %arg1: memref<3x8x128xf32, #tpu.memory_space<vmem>>, %arg2: memref<3x8x128xf32, #tpu.memory_space<vmem>>, %arg3: memref<6x8x128xf32, #tpu.memory_space<vmem>>) attributes {dimension_semantics = [#tpu.dimension_semantics<parallel>], iteration_bounds = array<i64: 1>, scalar_prefetch = 0 : i64, scratch_operands = 0 : i64, tpu.core_type = #tpu.core_type<tc>, window_params = [{transform_indices = @transform_0, window_bounds = array<i64: 3, 8, 128>}, {transform_indices = @transform_1, window_bounds = array<i64: 3, 8, 128>}, {transform_indices = @transform_2, window_bounds = array<i64: 6, 8, 128>}]} {
    %c0 = arith.constant 0 : index
    %c0_0 = arith.constant 0 : index
    %c0_1 = arith.constant 0 : index
    %0 = vector.load %arg1[%c0, %c0_0, %c0_1] : memref<3x8x128xf32, #tpu.memory_space<vmem>>, vector<1x8x128xf32>
    %1 = vector.shape_cast %0 : vector<1x8x128xf32> to vector<8x128xf32>
    %c1 = arith.constant 1 : index
    %c0_2 = arith.constant 0 : index
    %c0_3 = arith.constant 0 : index
    %2 = vector.load %arg1[%c1, %c0_2, %c0_3] : memref<3x8x128xf32, #tpu.memory_space<vmem>>, vector<1x8x128xf32>
    %3 = vector.shape_cast %2 : vector<1x8x128xf32> to vector<8x128xf32>
    %c2 = arith.constant 2 : index
    %c0_4 = arith.constant 0 : index
    %c0_5 = arith.constant 0 : index
    %4 = vector.load %arg1[%c2, %c0_4, %c0_5] : memref<3x8x128xf32, #tpu.memory_space<vmem>>, vector<1x8x128xf32>
    %5 = vector.shape_cast %4 : vector<1x8x128xf32> to vector<8x128xf32>
    %c0_6 = arith.constant 0 : index
    %c0_7 = arith.constant 0 : index
    %c0_8 = arith.constant 0 : index
    %6 = vector.load %arg2[%c0_6, %c0_7, %c0_8] : memref<3x8x128xf32, #tpu.memory_space<vmem>>, vector<1x8x128xf32>
    %7 = vector.shape_cast %6 : vector<1x8x128xf32> to vector<8x128xf32>
    %c1_9 = arith.constant 1 : index
    %c0_10 = arith.constant 0 : index
    %c0_11 = arith.constant 0 : index
    %8 = vector.load %arg2[%c1_9, %c0_10, %c0_11] : memref<3x8x128xf32, #tpu.memory_space<vmem>>, vector<1x8x128xf32>
    %9 = vector.shape_cast %8 : vector<1x8x128xf32> to vector<8x128xf32>
    %c2_12 = arith.constant 2 : index
    %c0_13 = arith.constant 0 : index
    %c0_14 = arith.constant 0 : index
    %10 = vector.load %arg2[%c2_12, %c0_13, %c0_14] : memref<3x8x128xf32, #tpu.memory_space<vmem>>, vector<1x8x128xf32>
    %11 = vector.shape_cast %10 : vector<1x8x128xf32> to vector<8x128xf32>
    %12 = arith.mulf %1, %7 : vector<8x128xf32>
    %cst = arith.constant 0.577350259 : f32
    %13 = vector.broadcast %cst : f32 to vector<8x128xf32>
    %14 = arith.mulf %13, %12 : vector<8x128xf32>
    %15 = arith.mulf %3, %9 : vector<8x128xf32>
    %cst_15 = arith.constant 0.577350259 : f32
    %16 = vector.broadcast %cst_15 : f32 to vector<8x128xf32>
    %17 = arith.mulf %16, %15 : vector<8x128xf32>
    %18 = arith.addf %14, %17 : vector<8x128xf32>
    %19 = arith.mulf %5, %11 : vector<8x128xf32>
    %cst_16 = arith.constant 0.577350259 : f32
    %20 = vector.broadcast %cst_16 : f32 to vector<8x128xf32>
    %21 = arith.mulf %20, %19 : vector<8x128xf32>
    %22 = arith.addf %18, %21 : vector<8x128xf32>
    %c0_17 = arith.constant 0 : index
    %c0_18 = arith.constant 0 : index
    %c0_19 = arith.constant 0 : index
    %23 = vector.load %arg3[%c0_17, %c0_18, %c0_19] : memref<6x8x128xf32, #tpu.memory_space<vmem>>, vector<1x8x128xf32>
    %24 = vector.shape_cast %23 : vector<1x8x128xf32> to vector<8x128xf32>
    %25 = vector.shape_cast %22 : vector<8x128xf32> to vector<1x8x128xf32>
    tpu.vector_store %arg3[%c0_17, %c0_18, %c0_19], %25 {strides = array<i32>} : memref<6x8x128xf32, #tpu.memory_space<vmem>>, vector<1x8x128xf32>,
    %26 = arith.mulf %1, %9 : vector<8x128xf32>
    %cst_20 = arith.constant 0.707106769 : f32
    %27 = vector.broadcast %cst_20 : f32 to vector<8x128xf32>
    %28 = arith.mulf %27, %26 : vector<8x128xf32>
    %29 = arith.mulf %3, %7 : vector<8x128xf32>
    %cst_21 = arith.constant 0.707106769 : f32
    %30 = vector.broadcast %cst_21 : f32 to vector<8x128xf32>
    %31 = arith.mulf %30, %29 : vector<8x128xf32>
    %32 = arith.addf %28, %31 : vector<8x128xf32>
    %c1_22 = arith.constant 1 : index
    %c0_23 = arith.constant 0 : index
    %c0_24 = arith.constant 0 : index
    %33 = vector.load %arg3[%c1_22, %c0_23, %c0_24] : memref<6x8x128xf32, #tpu.memory_space<vmem>>, vector<1x8x128xf32>
    %34 = vector.shape_cast %33 : vector<1x8x128xf32> to vector<8x128xf32>
    %35 = vector.shape_cast %32 : vector<8x128xf32> to vector<1x8x128xf32>
    tpu.vector_store %arg3[%c1_22, %c0_23, %c0_24], %35 {strides = array<i32>} : memref<6x8x128xf32, #tpu.memory_space<vmem>>, vector<1x8x128xf32>,
    %36 = arith.mulf %3, %11 : vector<8x128xf32>
    %cst_25 = arith.constant 0.707106769 : f32
    %37 = vector.broadcast %cst_25 : f32 to vector<8x128xf32>
    %38 = arith.mulf %37, %36 : vector<8x128xf32>
    %39 = arith.mulf %5, %9 : vector<8x128xf32>
    %cst_26 = arith.constant 0.707106769 : f32
    %40 = vector.broadcast %cst_26 : f32 to vector<8x128xf32>
    %41 = arith.mulf %40, %39 : vector<8x128xf32>
    %42 = arith.addf %38, %41 : vector<8x128xf32>
    %c2_27 = arith.constant 2 : index
    %c0_28 = arith.constant 0 : index
    %c0_29 = arith.constant 0 : index
    %43 = vector.load %arg3[%c2_27, %c0_28, %c0_29] : memref<6x8x128xf32, #tpu.memory_space<vmem>>, vector<1x8x128xf32>
    %44 = vector.shape_cast %43 : vector<1x8x128xf32> to vector<8x128xf32>
    %45 = vector.shape_cast %42 : vector<8x128xf32> to vector<1x8x128xf32>
    tpu.vector_store %arg3[%c2_27, %c0_28, %c0_29], %45 {strides = array<i32>} : memref<6x8x128xf32, #tpu.memory_space<vmem>>, vector<1x8x128xf32>,
    %cst_30 = arith.constant -0.408248305 : f32
    %46 = vector.broadcast %cst_30 : f32 to vector<8x128xf32>
    %47 = arith.mulf %46, %12 : vector<8x128xf32>
    %cst_31 = arith.constant -0.408248305 : f32
    %48 = vector.broadcast %cst_31 : f32 to vector<8x128xf32>
    %49 = arith.mulf %48, %15 : vector<8x128xf32>
    %50 = arith.addf %47, %49 : vector<8x128xf32>
    %cst_32 = arith.constant 0.816496611 : f32
    %51 = vector.broadcast %cst_32 : f32 to vector<8x128xf32>
    %52 = arith.mulf %51, %19 : vector<8x128xf32>
    %53 = arith.addf %50, %52 : vector<8x128xf32>
    %c3 = arith.constant 3 : index
    %c0_33 = arith.constant 0 : index
    %c0_34 = arith.constant 0 : index
    %54 = vector.load %arg3[%c3, %c0_33, %c0_34] : memref<6x8x128xf32, #tpu.memory_space<vmem>>, vector<1x8x128xf32>
    %55 = vector.shape_cast %54 : vector<1x8x128xf32> to vector<8x128xf32>
    %56 = vector.shape_cast %53 : vector<8x128xf32> to vector<1x8x128xf32>
    tpu.vector_store %arg3[%c3, %c0_33, %c0_34], %56 {strides = array<i32>} : memref<6x8x128xf32, #tpu.memory_space<vmem>>, vector<1x8x128xf32>,
    %57 = arith.mulf %1, %11 : vector<8x128xf32>
    %cst_35 = arith.constant 0.707106769 : f32
    %58 = vector.broadcast %cst_35 : f32 to vector<8x128xf32>
    %59 = arith.mulf %58, %57 : vector<8x128xf32>
    %60 = arith.mulf %5, %7 : vector<8x128xf32>
    %cst_36 = arith.constant 0.707106769 : f32
    %61 = vector.broadcast %cst_36 : f32 to vector<8x128xf32>
    %62 = arith.mulf %61, %60 : vector<8x128xf32>
    %63 = arith.addf %59, %62 : vector<8x128xf32>
    %c4 = arith.constant 4 : index
    %c0_37 = arith.constant 0 : index
    %c0_38 = arith.constant 0 : index
    %64 = vector.load %arg3[%c4, %c0_37, %c0_38] : memref<6x8x128xf32, #tpu.memory_space<vmem>>, vector<1x8x128xf32>
    %65 = vector.shape_cast %64 : vector<1x8x128xf32> to vector<8x128xf32>
    %66 = vector.shape_cast %63 : vector<8x128xf32> to vector<1x8x128xf32>
    tpu.vector_store %arg3[%c4, %c0_37, %c0_38], %66 {strides = array<i32>} : memref<6x8x128xf32, #tpu.memory_space<vmem>>, vector<1x8x128xf32>,
    %cst_39 = arith.constant 0.707106769 : f32
    %67 = vector.broadcast %cst_39 : f32 to vector<8x128xf32>
    %68 = arith.mulf %67, %12 : vector<8x128xf32>
    %cst_40 = arith.constant -0.707106769 : f32
    %69 = vector.broadcast %cst_40 : f32 to vector<8x128xf32>
    %70 = arith.mulf %69, %15 : vector<8x128xf32>
    %71 = arith.addf %68, %70 : vector<8x128xf32>
    %c5 = arith.constant 5 : index
    %c0_41 = arith.constant 0 : index
    %c0_42 = arith.constant 0 : index
    %72 = vector.load %arg3[%c5, %c0_41, %c0_42] : memref<6x8x128xf32, #tpu.memory_space<vmem>>, vector<1x8x128xf32>
    %73 = vector.shape_cast %72 : vector<1x8x128xf32> to vector<8x128xf32>
    %74 = vector.shape_cast %71 : vector<8x128xf32> to vector<1x8x128xf32>
    tpu.vector_store %arg3[%c5, %c0_41, %c0_42], %74 {strides = array<i32>} : memref<6x8x128xf32, #tpu.memory_space<vmem>>, vector<1x8x128xf32>,
    return
  }
  func.func @transform_0(%arg0: i32) -> (i32, i32, i32) {
    %c0_i32 = arith.constant 0 : i32
    %c0_i32_0 = arith.constant 0 : i32
    %c0_i32_1 = arith.constant 0 : i32
    return %c0_i32, %arg0, %c0_i32_0 : i32, i32, i32
  }
  func.func @transform_1(%arg0: i32) -> (i32, i32, i32) {
    %c0_i32 = arith.constant 0 : i32
    %c0_i32_0 = arith.constant 0 : i32
    %c0_i32_1 = arith.constant 0 : i32
    return %c0_i32, %arg0, %c0_i32_0 : i32, i32, i32
  }
  func.func @transform_2(%arg0: i32) -> (i32, i32, i32) {
    %c0_i32 = arith.constant 0 : i32
    %c0_i32_0 = arith.constant 0 : i32
    %c0_i32_1 = arith.constant 0 : i32
    return %c0_i32, %arg0, %c0_i32_0 : i32, i32, i32
  }
}

</mosaic_0001>

<bundles_post_ra>
// kernel: _lambda_.1
= control target key start
LH: loop header
LB: loop body
LE: loop exit
PB: predicated region body
PF: predicated region fallthrough
CT: control target
= control target key end

     0   :  { %s127_s0 = inlined_call_operand.vmem [shape: f32[3,8,128], index: 0, kind: input, shape index: {}]   ;;  %s128_s1 = inlined_call_operand.vmem [shape: f32[3,8,128], index: 1, kind: input, shape index: {}]   ;;  %s129_s2 = inlined_call_operand.vmem [shape: f32[6,8,128], index: 2, kind: output, shape index: {}]  }
   0x1   :  { %v11_v0 = vld [vmem:[%s127_s0] sm:$0xff]  ;;  %v67_v1 = vld [vmem:[%s127_s0 + $0x8] sm:$0xff]  ;;  %v68_v2 = vld [vmem:[%s127_s0 + $0x10] sm:$0xff] }
   0x2   :  { %v16_v3 = vld [vmem:[%s128_s1] sm:$0xff]  ;;  %v69_v4 = vld [vmem:[%s128_s1 + $0x8] sm:$0xff]  ;;  %v70_v5 = vld [vmem:[%s128_s1 + $0x10] sm:$0xff] }
   0x3   :  { %v21_v6 = vmul.f32 %v16_v3, %v11_v0  ;;  %v23_v7 = vmul.f32 %v69_v4, %v67_v1  ;;  %v26_v8 = vmul.f32 %v70_v5, %v68_v2  ;;  %v30_v9 = vmul.f32 %v69_v4, %v11_v0 }
   0x4   :  { %v32_v10 = vmul.f32 %v67_v1, %v16_v3  ;;  %v37_v11 = vmul.f32 %v70_v5, %v67_v1  ;;  %v39_v12 = vmul.f32 %v69_v4, %v68_v2  ;;  %v51_v13 = vmul.f32 %v70_v5, %v11_v0 }
   0x5   :  { %v22_v14 = vmul.f32 0.57735026, %v21_v6  ;;  %v24_v15 = vmul.f32 0.57735026, %v23_v7  ;;  %v27_v16 = vmul.f32 0.57735026, %v26_v8  ;;  %v53_v17 = vmul.f32 %v68_v2, %v16_v3 }
   0x6   :  { %v31_v18 = vmul.f32 0.70710677, %v30_v9  ;;  %v33_v19 = vmul.f32 0.70710677, %v32_v10  ;;  %v38_v20 = vmul.f32 0.70710677, %v37_v11 }
   0x7   :  { %v25_v21 = vadd.f32 %v24_v15, %v22_v14  ;;  %v40_v22 = vmul.f32 0.70710677, %v39_v12  ;;  %v44_v23 = vmul.f32 -0.4082483, %v21_v6  ;;  %v45_v24 = vmul.f32 -0.4082483, %v23_v7 }
   0x8   :  { %v34_v25 = vadd.f32 %v33_v19, %v31_v18  ;;  %v47_v26 = vmul.f32 0.8164966, %v26_v8  ;;  %v52_v27 = vmul.f32 0.70710677, %v51_v13  ;;  %v54_v28 = vmul.f32 0.70710677, %v53_v17 }
   0x9   :  { %v28_v29 = vadd.f32 %v27_v16, %v25_v21  ;;  %v41_v30 = vadd.f32 %v40_v22, %v38_v20  ;;  %v46_v31 = vadd.f32 %v45_v24, %v44_v23  ;;  %v58_v32 = vmul.f32 0.70710677, %v21_v6 }
   0xa   :  { %71 = vst [vmem:[%s129_s2 + $0x8] sm:$0xff] %v34_v25  ;;  %v55_v33 = vadd.f32 %v54_v28, %v52_v27  ;;  %v59_v34 = vmul.f32 -0.70710677, %v23_v7 }
   0xb   :  { %29 = vst [vmem:[%s129_s2] sm:$0xff] %v28_v29  ;;  %72 = vst [vmem:[%s129_s2 + $0x10] sm:$0xff] %v41_v30  ;;  %v48_v35 = vadd.f32 %v47_v26, %v46_v31 }
   0xc   :  { %74 = vst [vmem:[%s129_s2 + $0x20] sm:$0xff] %v55_v33  ;;  %v60_v36 = vadd.f32 %v59_v34, %v58_v32 }
   0xd   :  { %73 = vst [vmem:[%s129_s2 + $0x18] sm:$0xff] %v48_v35 }
   0xe   :  { %75 = vst [vmem:[%s129_s2 + $0x28] sm:$0xff] %v60_v36 }

</bundles_post_ra>
